<compile_context>
chip_gen: v7x
topology: tpu7x:2x2x1
jax: 0.10.0
libtpu: 0.0.40
codegen_flags: <defaults>
</compile_context>

<pallas_src>
import functools

import jax
import jax.numpy as jnp
from jax.experimental import pallas as pl
from jax.experimental.pallas import tpu as pltpu

EMBED_SIZE = 32            # opt.embed_size
HIDDEN = EMBED_SIZE // 2   # fc1 / fc2 output width
MARGIN = 0.2               # opt.margin (forward() uses opt.margin, not the ctor default)
COS_EPS = 1e-8             # torch.cosine_similarity eps

_VMEM = pl.BlockSpec(memory_space=pltpu.MemorySpace.VMEM)


def _contrastive_loss_kernel(x_ref, w_ref, out_ref, *, margin, batch, seq, e, h):
    """Entire ContrastiveSemanticLoss.forward fused into one kernel.

    x_ref : (L, B, 2E) -- [init | target] packed on the lane axis, mean axis first.
    w_ref : (2E+1, 2H) -- block-diag(fc1.w, fc2.w) with [b1 | b2] as the last row.
    """
    f32 = jnp.float32

    # ---- 1. mean over dim=1: L contiguous (B, 2E) slab adds on the VPU ------
    acc = x_ref[0]
    for l in range(1, seq):                       # static unroll, L is tiny
        acc = acc + x_ref[l]
    mean = acc * (1.0 / float(seq))                                     # (B, 2E)

    # ---- 2. fused fc1/fc2 projection (one MXU matmul, bias folded in) -------
    w_main = w_ref[0:2 * e, :]                                          # (2E, 2H)
    w_bias = w_ref[2 * e:2 * e + 1, :]                                  # (1, 2H)
    proj = jnp.dot(mean, w_main, preferred_element_type=f32) + w_bias   # (B, 2H)
    i_proj = proj[:, :h]                                                # fc1(mean_init)
    t_proj = proj[:, h:]                                                # fc2(mean_target)

    # ---- 3. cosine-similarity matrices (B, B), transpose-free ---------------
    ni = jnp.sqrt(jnp.sum(i_proj * i_proj, axis=1, keepdims=True))      # (B, 1)
    nt = jnp.sqrt(jnp.sum(t_proj * t_proj, axis=1, keepdims=True))      # (B, 1)
    i_n = i_proj / jnp.maximum(ni, COS_EPS)
    t_n = t_proj / jnp.maximum(nt, COS_EPS)
    dn = (((1,), (1,)), ((), ()))
    scores = jax.lax.dot_general(i_n, t_n, dn, preferred_element_type=f32)    # (B, B)
    scores_t = jax.lax.dot_general(t_n, i_n, dn, preferred_element_type=f32)  # scores.T

    # ---- 4. margin costs (cost_s produced already transposed, diag removed) -
    row = jax.lax.broadcasted_iota(jnp.int32, (batch, batch), 0)
    col = jax.lax.broadcasted_iota(jnp.int32, (batch, batch), 1)
    eye = row == col
    diag_row = jnp.sum(jnp.where(eye, scores, 0.0), axis=0, keepdims=True)    # (1, B): scores[j, j]
    # cost_s^T[j, i] = clamp(margin + scores[i, j] - scores[i, i], 0), diag zeroed
    cost_s_t = jnp.where(eye, 0.0, jnp.maximum(margin + scores_t - diag_row, 0.0))
    # cost_im[i, j]  = clamp(margin + scores[i, j] - scores[j, j], 0), diag zeroed
    cost_im = jnp.where(eye, 0.0, jnp.maximum(margin + scores - diag_row, 0.0))

    # ---- 5. DynamicTopK_Negative: fused rank-threshold selection ------------
    # topK = int(count(cost_s > 0) / (B + 1e-5) + 1)  (count(cost_s^T>0) is identical)
    pos = (cost_s_t > 0.0).astype(f32)
    num_pos = jnp.sum(jnp.sum(pos, axis=1, keepdims=True), axis=0, keepdims=True)
    topk = jnp.floor(num_pos / (float(batch) + 1e-5) + 1.0)                   # (1, 1)

    # Columns of `stacked` are exactly the rows of cost_s and the columns of
    # cost_im.  Rank every element within its column via B sublane-broadcast
    # compares (ties broken by row index); keeping rank < topK and summing is
    # exactly sort(descending)[:topK].sum() for both halves in one pass.
    stacked = jnp.concatenate([cost_s_t, cost_im], axis=1)                    # (B, 2B)
    ridx = jax.lax.broadcasted_iota(jnp.int32, (batch, 2 * batch), 0)
    rank = jnp.zeros_like(stacked)
    for k in range(batch):                        # static unroll, B is tiny
        pivot = stacked[k:k + 1, :]               # (1, 2B) sublane broadcast
        gt = (pivot > stacked).astype(f32)
        tie = jnp.logical_and(pivot == stacked, ridx > k).astype(f32)
        rank = rank + gt + tie
    kept = jnp.where(rank < topk, stacked, 0.0)
    out_ref[...] = jnp.sum(jnp.sum(kept, axis=1, keepdims=True), axis=0, keepdims=True)


def contrastive_semantic_loss(init_features, target_features, params, margin=MARGIN):
    """JAX/Pallas equivalent of ContrastiveSemanticLoss.forward (scalar loss)."""
    b, l, e = init_features.shape
    h = params["w1"].shape[1]

    # Pack both streams on the lane axis and put the mean-reduction axis first,
    # so the kernel accumulates L contiguous (B, 2E) slabs (layout plumbing only).
    x = jnp.concatenate([init_features, target_features], axis=-1)      # (B, L, 2E)
    x = jnp.transpose(x, (1, 0, 2)).astype(jnp.float32)                 # (L, B, 2E)

    # Block-diagonal fc1/fc2 weight with the biases folded in as the last row.
    zeros_eh = jnp.zeros((e, h), jnp.float32)
    w_top = jnp.concatenate(
        [jnp.concatenate([params["w1"], zeros_eh], axis=1),
         jnp.concatenate([zeros_eh, params["w2"]], axis=1)], axis=0)    # (2E, 2H)
    bias_row = jnp.concatenate([params["b1"], params["b2"]]).reshape(1, 2 * h)
    w = jnp.concatenate([w_top, bias_row], axis=0)                      # (2E+1, 2H)

    out = pl.pallas_call(
        functools.partial(_contrastive_loss_kernel, margin=float(margin),
                          batch=b, seq=l, e=e, h=h),
        out_shape=jax.ShapeDtypeStruct((1, 1), jnp.float32),
        in_specs=[_VMEM, _VMEM],
        out_specs=_VMEM,
    )(x, w)
    return out[0, 0]


def init_params(key):
    # Matches the module's init: weights ~ U(-r, r), r = sqrt(6/(in+out)); bias 0.
    # (Weights stored as (in, out) so the kernel computes x @ W directly.)
    k1, k2 = jax.random.split(key)
    r = (6.0 ** 0.5) / float((EMBED_SIZE + HIDDEN) ** 0.5)
    return {
        "w1": jax.random.uniform(k1, (EMBED_SIZE, HIDDEN), jnp.float32, -r, r),
        "b1": jnp.zeros((HIDDEN,), jnp.float32),
        "w2": jax.random.uniform(k2, (EMBED_SIZE, HIDDEN), jnp.float32, -r, r),
        "b2": jnp.zeros((HIDDEN,), jnp.float32),
    }


if __name__ == "__main__":
    key = jax.random.PRNGKey(0)
    pkey, ikey, tkey = jax.random.split(key, 3)
    params = init_params(pkey)

    B, L = 8, 4   # batch of (B, L, EMBED_SIZE) region features; B > 1 so .squeeze() is a no-op
    init_features = jax.random.normal(ikey, (B, L, EMBED_SIZE), jnp.float32)
    target_features = jax.random.normal(tkey, (B, L, EMBED_SIZE), jnp.float32)

    loss = jax.jit(contrastive_semantic_loss)(init_features, target_features, params)
    loss = jax.block_until_ready(loss)
    assert loss.shape == () and loss.dtype == jnp.float32
    assert bool(jnp.isfinite(loss))
    # TODO(synk): margin/embed_size come from `opt` in the original; fixed here
    # as constants (MARGIN=0.2, EMBED_SIZE=32) with synthetic fc1/fc2 weights.
    print("KERNEL_OK")
</pallas_src>

<mosaic_0001>
module attributes {stable_mosaic.version = 11 : i64} {
  func.func @_contrastive_loss_kernel(%arg0: memref<4x8x64xf32, #tpu.memory_space<vmem>>, %arg1: memref<65x32xf32, #tpu.memory_space<vmem>>, %arg2: memref<1x1xf32, #tpu.memory_space<vmem>>) attributes {dimension_semantics = [], scalar_prefetch = 0 : i64, scratch_operands = 0 : i64, tpu.core_type = #tpu.core_type<tc>} {
    %c0 = arith.constant 0 : index
    %c0_0 = arith.constant 0 : index
    %c0_1 = arith.constant 0 : index
    %0 = vector.load %arg0[%c0, %c0_0, %c0_1] : memref<4x8x64xf32, #tpu.memory_space<vmem>>, vector<1x8x64xf32>
    %1 = vector.shape_cast %0 : vector<1x8x64xf32> to vector<8x64xf32>
    %c1 = arith.constant 1 : index
    %c0_2 = arith.constant 0 : index
    %c0_3 = arith.constant 0 : index
    %2 = vector.load %arg0[%c1, %c0_2, %c0_3] : memref<4x8x64xf32, #tpu.memory_space<vmem>>, vector<1x8x64xf32>
    %3 = vector.shape_cast %2 : vector<1x8x64xf32> to vector<8x64xf32>
    %4 = arith.addf %1, %3 : vector<8x64xf32>
    %c2 = arith.constant 2 : index
    %c0_4 = arith.constant 0 : index
    %c0_5 = arith.constant 0 : index
    %5 = vector.load %arg0[%c2, %c0_4, %c0_5] : memref<4x8x64xf32, #tpu.memory_space<vmem>>, vector<1x8x64xf32>
    %6 = vector.shape_cast %5 : vector<1x8x64xf32> to vector<8x64xf32>
    %7 = arith.addf %4, %6 : vector<8x64xf32>
    %c3 = arith.constant 3 : index
    %c0_6 = arith.constant 0 : index
    %c0_7 = arith.constant 0 : index
    %8 = vector.load %arg0[%c3, %c0_6, %c0_7] : memref<4x8x64xf32, #tpu.memory_space<vmem>>, vector<1x8x64xf32>
    %9 = vector.shape_cast %8 : vector<1x8x64xf32> to vector<8x64xf32>
    %10 = arith.addf %7, %9 : vector<8x64xf32>
    %cst = arith.constant 2.500000e-01 : f32
    %11 = vector.broadcast %cst : f32 to vector<8x64xf32>
    %12 = arith.mulf %10, %11 : vector<8x64xf32>
    %c0_8 = arith.constant 0 : index
    %c0_9 = arith.constant 0 : index
    %13 = vector.load %arg1[%c0_8, %c0_9] : memref<65x32xf32, #tpu.memory_space<vmem>>, vector<64x32xf32>
    %c64 = arith.constant 64 : index
    %c0_10 = arith.constant 0 : index
    %14 = vector.load %arg1[%c64, %c0_10] : memref<65x32xf32, #tpu.memory_space<vmem>>, vector<1x32xf32>
    %cst_11 = arith.constant dense<0.000000e+00> : vector<8x32xf32>
    %15 = tpu.matmul %12, %13, %cst_11 {dimension_numbers = #tpu.dot_dimension_numbers<[1], [0], [0], [1], [0, 0, 1, 1], [], []>} : vector<8x64xf32>, vector<64x32xf32>, vector<8x32xf32> -> vector<8x32xf32>
    %16 = vector.broadcast %14 : vector<1x32xf32> to vector<8x32xf32>
    %17 = arith.addf %15, %16 : vector<8x32xf32>
    %18 = vector.extract_strided_slice %17 {offsets = [0, 0], sizes = [8, 16], strides = [1, 1]} : vector<8x32xf32> to vector<8x16xf32>
    %19 = vector.extract_strided_slice %17 {offsets = [0, 16], sizes = [8, 16], strides = [1, 1]} : vector<8x32xf32> to vector<8x16xf32>
    %20 = arith.mulf %18, %18 : vector<8x16xf32>
    %cst_12 = arith.constant dense<0.000000e+00> : vector<8xf32>
    %21 = vector.multi_reduction <add>, %20, %cst_12 [1] : vector<8x16xf32> to vector<8xf32>
    %22 = vector.shape_cast %21 : vector<8xf32> to vector<8x1xf32>
    %23 = math.sqrt %22 : vector<8x1xf32>
    %24 = arith.mulf %19, %19 : vector<8x16xf32>
    %cst_13 = arith.constant dense<0.000000e+00> : vector<8xf32>
    %25 = vector.multi_reduction <add>, %24, %cst_13 [1] : vector<8x16xf32> to vector<8xf32>
    %26 = vector.shape_cast %25 : vector<8xf32> to vector<8x1xf32>
    %27 = math.sqrt %26 : vector<8x1xf32>
    %cst_14 = arith.constant 9.99999993E-9 : f32
    %28 = vector.broadcast %cst_14 : f32 to vector<8x1xf32>
    %29 = arith.maximumf %23, %28 : vector<8x1xf32>
    %30 = vector.broadcast %29 : vector<8x1xf32> to vector<8x16xf32>
    %31 = arith.divf %18, %30 : vector<8x16xf32>
    %cst_15 = arith.constant 9.99999993E-9 : f32
    %32 = vector.broadcast %cst_15 : f32 to vector<8x1xf32>
    %33 = arith.maximumf %27, %32 : vector<8x1xf32>
    %34 = vector.broadcast %33 : vector<8x1xf32> to vector<8x16xf32>
    %35 = arith.divf %19, %34 : vector<8x16xf32>
    %cst_16 = arith.constant dense<0.000000e+00> : vector<8x8xf32>
    %36 = tpu.matmul %31, %35, %cst_16 {dimension_numbers = #tpu.dot_dimension_numbers<[1], [1], [0], [0], [0, 0, 1, 0], [], []>} : vector<8x16xf32>, vector<8x16xf32>, vector<8x8xf32> -> vector<8x8xf32>
    %cst_17 = arith.constant dense<0.000000e+00> : vector<8x8xf32>
    %37 = tpu.matmul %35, %31, %cst_17 {dimension_numbers = #tpu.dot_dimension_numbers<[1], [1], [0], [0], [0, 0, 1, 0], [], []>} : vector<8x16xf32>, vector<8x16xf32>, vector<8x8xf32> -> vector<8x8xf32>
    %38 = tpu.iota {dimensions = array<i32: 0>} : vector<8x8xi32>
    %39 = tpu.iota {dimensions = array<i32: 1>} : vector<8x8xi32>
    %40 = arith.cmpi eq, %38, %39 : vector<8x8xi32>
    %cst_18 = arith.constant 0.000000e+00 : f32
    %41 = vector.broadcast %cst_18 : f32 to vector<8x8xf32>
    %42 = arith.select %40, %36, %41 : vector<8x8xi1>, vector<8x8xf32>
    %cst_19 = arith.constant dense<0.000000e+00> : vector<8xf32>
    %43 = vector.multi_reduction <add>, %42, %cst_19 [0] : vector<8x8xf32> to vector<8xf32>
    %44 = vector.shape_cast %43 : vector<8xf32> to vector<1x8xf32>
    %cst_20 = arith.constant 2.000000e-01 : f32
    %45 = vector.broadcast %cst_20 : f32 to vector<8x8xf32>
    %46 = arith.addf %45, %37 : vector<8x8xf32>
    %47 = vector.broadcast %44 : vector<1x8xf32> to vector<8x8xf32>
    %48 = arith.subf %46, %47 : vector<8x8xf32>
    %cst_21 = arith.constant 0.000000e+00 : f32
    %49 = vector.broadcast %cst_21 : f32 to vector<8x8xf32>
    %50 = arith.maximumf %48, %49 : vector<8x8xf32>
    %cst_22 = arith.constant 0.000000e+00 : f32
    %51 = vector.broadcast %cst_22 : f32 to vector<8x8xf32>
    %52 = arith.select %40, %51, %50 : vector<8x8xi1>, vector<8x8xf32>
    %cst_23 = arith.constant 2.000000e-01 : f32
    %53 = vector.broadcast %cst_23 : f32 to vector<8x8xf32>
    %54 = arith.addf %53, %36 : vector<8x8xf32>
    %55 = vector.broadcast %44 : vector<1x8xf32> to vector<8x8xf32>
    %56 = arith.subf %54, %55 : vector<8x8xf32>
    %cst_24 = arith.constant 0.000000e+00 : f32
    %57 = vector.broadcast %cst_24 : f32 to vector<8x8xf32>
    %58 = arith.maximumf %56, %57 : vector<8x8xf32>
    %cst_25 = arith.constant 0.000000e+00 : f32
    %59 = vector.broadcast %cst_25 : f32 to vector<8x8xf32>
    %60 = arith.select %40, %59, %58 : vector<8x8xi1>, vector<8x8xf32>
    %cst_26 = arith.constant 0.000000e+00 : f32
    %61 = vector.broadcast %cst_26 : f32 to vector<8x8xf32>
    %62 = arith.cmpf ogt, %52, %61 : vector<8x8xf32>
    %63 = arith.extui %62 : vector<8x8xi1> to vector<8x8xi32>
    %64 = arith.sitofp %63 : vector<8x8xi32> to vector<8x8xf32>
    %cst_27 = arith.constant dense<0.000000e+00> : vector<8xf32>
    %65 = vector.multi_reduction <add>, %64, %cst_27 [1] : vector<8x8xf32> to vector<8xf32>
    %66 = vector.shape_cast %65 : vector<8xf32> to vector<8x1xf32>
    %cst_28 = arith.constant dense<0.000000e+00> : vector<1xf32>
    %67 = vector.multi_reduction <add>, %66, %cst_28 [0] : vector<8x1xf32> to vector<1xf32>
    %68 = vector.shape_cast %67 : vector<1xf32> to vector<1x1xf32>
    %cst_29 = arith.constant 8.00000953 : f32
    %69 = vector.broadcast %cst_29 : f32 to vector<1x1xf32>
    %70 = arith.divf %68, %69 : vector<1x1xf32>
    %cst_30 = arith.constant 1.000000e+00 : f32
    %71 = vector.broadcast %cst_30 : f32 to vector<1x1xf32>
    %72 = arith.addf %70, %71 : vector<1x1xf32>
    %73 = math.floor %72 : vector<1x1xf32>
    %74 = tpu.concatenate %52, %60 in 1 : vector<8x8xf32>, vector<8x8xf32> -> vector<8x16xf32>
    %75 = tpu.iota {dimensions = array<i32: 0>} : vector<8x16xi32>
    %cst_31 = arith.constant 0.000000e+00 : f32
    %76 = vector.broadcast %cst_31 : f32 to vector<8x16xf32>
    %77 = vector.extract_strided_slice %74 {offsets = [0, 0], sizes = [1, 16], strides = [1, 1]} : vector<8x16xf32> to vector<1x16xf32>
    %78 = vector.broadcast %77 : vector<1x16xf32> to vector<8x16xf32>
    %79 = arith.cmpf ogt, %78, %74 : vector<8x16xf32>
    %80 = arith.extui %79 : vector<8x16xi1> to vector<8x16xi32>
    %81 = arith.sitofp %80 : vector<8x16xi32> to vector<8x16xf32>
    %82 = vector.broadcast %77 : vector<1x16xf32> to vector<8x16xf32>
    %83 = arith.cmpf oeq, %82, %74 : vector<8x16xf32>
    %c0_i32 = arith.constant 0 : i32
    %84 = vector.broadcast %c0_i32 : i32 to vector<8x16xi32>
    %85 = arith.cmpi sgt, %75, %84 : vector<8x16xi32>
    %86 = arith.andi %83, %85 : vector<8x16xi1>
    %87 = arith.extui %86 : vector<8x16xi1> to vector<8x16xi32>
    %88 = arith.sitofp %87 : vector<8x16xi32> to vector<8x16xf32>
    %89 = arith.addf %76, %81 : vector<8x16xf32>
    %90 = arith.addf %89, %88 : vector<8x16xf32>
    %91 = vector.extract_strided_slice %74 {offsets = [1, 0], sizes = [1, 16], strides = [1, 1]} : vector<8x16xf32> to vector<1x16xf32>
    %92 = vector.broadcast %91 : vector<1x16xf32> to vector<8x16xf32>
    %93 = arith.cmpf ogt, %92, %74 : vector<8x16xf32>
    %94 = arith.extui %93 : vector<8x16xi1> to vector<8x16xi32>
    %95 = arith.sitofp %94 : vector<8x16xi32> to vector<8x16xf32>
    %96 = vector.broadcast %91 : vector<1x16xf32> to vector<8x16xf32>
    %97 = arith.cmpf oeq, %96, %74 : vector<8x16xf32>
    %c1_i32 = arith.constant 1 : i32
    %98 = vector.broadcast %c1_i32 : i32 to vector<8x16xi32>
    %99 = arith.cmpi sgt, %75, %98 : vector<8x16xi32>
    %100 = arith.andi %97, %99 : vector<8x16xi1>
    %101 = arith.extui %100 : vector<8x16xi1> to vector<8x16xi32>
    %102 = arith.sitofp %101 : vector<8x16xi32> to vector<8x16xf32>
    %103 = arith.addf %90, %95 : vector<8x16xf32>
    %104 = arith.addf %103, %102 : vector<8x16xf32>
    %105 = vector.extract_strided_slice %74 {offsets = [2, 0], sizes = [1, 16], strides = [1, 1]} : vector<8x16xf32> to vector<1x16xf32>
    %106 = vector.broadcast %105 : vector<1x16xf32> to vector<8x16xf32>
    %107 = arith.cmpf ogt, %106, %74 : vector<8x16xf32>
    %108 = arith.extui %107 : vector<8x16xi1> to vector<8x16xi32>
    %109 = arith.sitofp %108 : vector<8x16xi32> to vector<8x16xf32>
    %110 = vector.broadcast %105 : vector<1x16xf32> to vector<8x16xf32>
    %111 = arith.cmpf oeq, %110, %74 : vector<8x16xf32>
    %c2_i32 = arith.constant 2 : i32
    %112 = vector.broadcast %c2_i32 : i32 to vector<8x16xi32>
    %113 = arith.cmpi sgt, %75, %112 : vector<8x16xi32>
    %114 = arith.andi %111, %113 : vector<8x16xi1>
    %115 = arith.extui %114 : vector<8x16xi1> to vector<8x16xi32>
    %116 = arith.sitofp %115 : vector<8x16xi32> to vector<8x16xf32>
    %117 = arith.addf %104, %109 : vector<8x16xf32>
    %118 = arith.addf %117, %116 : vector<8x16xf32>
    %119 = vector.extract_strided_slice %74 {offsets = [3, 0], sizes = [1, 16], strides = [1, 1]} : vector<8x16xf32> to vector<1x16xf32>
    %120 = vector.broadcast %119 : vector<1x16xf32> to vector<8x16xf32>
    %121 = arith.cmpf ogt, %120, %74 : vector<8x16xf32>
    %122 = arith.extui %121 : vector<8x16xi1> to vector<8x16xi32>
    %123 = arith.sitofp %122 : vector<8x16xi32> to vector<8x16xf32>
    %124 = vector.broadcast %119 : vector<1x16xf32> to vector<8x16xf32>
    %125 = arith.cmpf oeq, %124, %74 : vector<8x16xf32>
    %c3_i32 = arith.constant 3 : i32
    %126 = vector.broadcast %c3_i32 : i32 to vector<8x16xi32>
    %127 = arith.cmpi sgt, %75, %126 : vector<8x16xi32>
    %128 = arith.andi %125, %127 : vector<8x16xi1>
    %129 = arith.extui %128 : vector<8x16xi1> to vector<8x16xi32>
    %130 = arith.sitofp %129 : vector<8x16xi32> to vector<8x16xf32>
    %131 = arith.addf %118, %123 : vector<8x16xf32>
    %132 = arith.addf %131, %130 : vector<8x16xf32>
    %133 = vector.extract_strided_slice %74 {offsets = [4, 0], sizes = [1, 16], strides = [1, 1]} : vector<8x16xf32> to vector<1x16xf32>
    %134 = vector.broadcast %133 : vector<1x16xf32> to vector<8x16xf32>
    %135 = arith.cmpf ogt, %134, %74 : vector<8x16xf32>
    %136 = arith.extui %135 : vector<8x16xi1> to vector<8x16xi32>
    %137 = arith.sitofp %136 : vector<8x16xi32> to vector<8x16xf32>
    %138 = vector.broadcast %133 : vector<1x16xf32> to vector<8x16xf32>
    %139 = arith.cmpf oeq, %138, %74 : vector<8x16xf32>
    %c4_i32 = arith.constant 4 : i32
    %140 = vector.broadcast %c4_i32 : i32 to vector<8x16xi32>
    %141 = arith.cmpi sgt, %75, %140 : vector<8x16xi32>
    %142 = arith.andi %139, %141 : vector<8x16xi1>
    %143 = arith.extui %142 : vector<8x16xi1> to vector<8x16xi32>
    %144 = arith.sitofp %143 : vector<8x16xi32> to vector<8x16xf32>
    %145 = arith.addf %132, %137 : vector<8x16xf32>
    %146 = arith.addf %145, %144 : vector<8x16xf32>
    %147 = vector.extract_strided_slice %74 {offsets = [5, 0], sizes = [1, 16], strides = [1, 1]} : vector<8x16xf32> to vector<1x16xf32>
    %148 = vector.broadcast %147 : vector<1x16xf32> to vector<8x16xf32>
    %149 = arith.cmpf ogt, %148, %74 : vector<8x16xf32>
    %150 = arith.extui %149 : vector<8x16xi1> to vector<8x16xi32>
    %151 = arith.sitofp %150 : vector<8x16xi32> to vector<8x16xf32>
    %152 = vector.broadcast %147 : vector<1x16xf32> to vector<8x16xf32>
    %153 = arith.cmpf oeq, %152, %74 : vector<8x16xf32>
    %c5_i32 = arith.constant 5 : i32
    %154 = vector.broadcast %c5_i32 : i32 to vector<8x16xi32>
    %155 = arith.cmpi sgt, %75, %154 : vector<8x16xi32>
    %156 = arith.andi %153, %155 : vector<8x16xi1>
    %157 = arith.extui %156 : vector<8x16xi1> to vector<8x16xi32>
    %158 = arith.sitofp %157 : vector<8x16xi32> to vector<8x16xf32>
    %159 = arith.addf %146, %151 : vector<8x16xf32>
    %160 = arith.addf %159, %158 : vector<8x16xf32>
    %161 = vector.extract_strided_slice %74 {offsets = [6, 0], sizes = [1, 16], strides = [1, 1]} : vector<8x16xf32> to vector<1x16xf32>
    %162 = vector.broadcast %161 : vector<1x16xf32> to vector<8x16xf32>
    %163 = arith.cmpf ogt, %162, %74 : vector<8x16xf32>
    %164 = arith.extui %163 : vector<8x16xi1> to vector<8x16xi32>
    %165 = arith.sitofp %164 : vector<8x16xi32> to vector<8x16xf32>
    %166 = vector.broadcast %161 : vector<1x16xf32> to vector<8x16xf32>
    %167 = arith.cmpf oeq, %166, %74 : vector<8x16xf32>
    %c6_i32 = arith.constant 6 : i32
    %168 = vector.broadcast %c6_i32 : i32 to vector<8x16xi32>
    %169 = arith.cmpi sgt, %75, %168 : vector<8x16xi32>
    %170 = arith.andi %167, %169 : vector<8x16xi1>
    %171 = arith.extui %170 : vector<8x16xi1> to vector<8x16xi32>
    %172 = arith.sitofp %171 : vector<8x16xi32> to vector<8x16xf32>
    %173 = arith.addf %160, %165 : vector<8x16xf32>
    %174 = arith.addf %173, %172 : vector<8x16xf32>
    %175 = vector.extract_strided_slice %74 {offsets = [7, 0], sizes = [1, 16], strides = [1, 1]} : vector<8x16xf32> to vector<1x16xf32>
    %176 = vector.broadcast %175 : vector<1x16xf32> to vector<8x16xf32>
    %177 = arith.cmpf ogt, %176, %74 : vector<8x16xf32>
    %178 = arith.extui %177 : vector<8x16xi1> to vector<8x16xi32>
    %179 = arith.sitofp %178 : vector<8x16xi32> to vector<8x16xf32>
    %180 = vector.broadcast %175 : vector<1x16xf32> to vector<8x16xf32>
    %181 = arith.cmpf oeq, %180, %74 : vector<8x16xf32>
    %c7_i32 = arith.constant 7 : i32
    %182 = vector.broadcast %c7_i32 : i32 to vector<8x16xi32>
    %183 = arith.cmpi sgt, %75, %182 : vector<8x16xi32>
    %184 = arith.andi %181, %183 : vector<8x16xi1>
    %185 = arith.extui %184 : vector<8x16xi1> to vector<8x16xi32>
    %186 = arith.sitofp %185 : vector<8x16xi32> to vector<8x16xf32>
    %187 = arith.addf %174, %179 : vector<8x16xf32>
    %188 = arith.addf %187, %186 : vector<8x16xf32>
    %189 = vector.broadcast %73 : vector<1x1xf32> to vector<8x16xf32>
    %190 = arith.cmpf olt, %188, %189 : vector<8x16xf32>
    %cst_32 = arith.constant 0.000000e+00 : f32
    %191 = vector.broadcast %cst_32 : f32 to vector<8x16xf32>
    %192 = arith.select %190, %74, %191 : vector<8x16xi1>, vector<8x16xf32>
    %cst_33 = arith.constant dense<0.000000e+00> : vector<8xf32>
    %193 = vector.multi_reduction <add>, %192, %cst_33 [1] : vector<8x16xf32> to vector<8xf32>
    %194 = vector.shape_cast %193 : vector<8xf32> to vector<8x1xf32>
    %cst_34 = arith.constant dense<0.000000e+00> : vector<1xf32>
    %195 = vector.multi_reduction <add>, %194, %cst_34 [0] : vector<8x1xf32> to vector<1xf32>
    %196 = vector.shape_cast %195 : vector<1xf32> to vector<1x1xf32>
    %c0_35 = arith.constant 0 : index
    %c0_36 = arith.constant 0 : index
    %197 = vector.load %arg2[%c0_35, %c0_36] : memref<1x1xf32, #tpu.memory_space<vmem>>, vector<1x1xf32>
    tpu.vector_store %arg2[%c0_35, %c0_36], %196 {strides = array<i32>} : memref<1x1xf32, #tpu.memory_space<vmem>>, vector<1x1xf32>,
    return
  }
}

</mosaic_0001>

<bundles_post_ra>
// kernel: contrastive_semantic_loss.1
= control target key start
LH: loop header
LB: loop body
LE: loop exit
PB: predicated region body
PF: predicated region fallthrough
CT: control target
= control target key end

     0   :  { %v588_v3 = vmov 0.0|0.0   ;;  %vm589_vm0 = vmmov 0   ;;  %v590_v6 = vmov 0.0   ;;  %s744_s0 = inlined_call_operand.vmem [shape: f32[4,8,64], index: 0, kind: input, shape index: {}]   ;;  %s745_s1 = inlined_call_operand.vmem [shape: f32[65,32], index: 1, kind: input, shape index: {}]   ;;  %s746_s2 = inlined_call_operand.hbm [shape: f32[1,1], index: 2, kind: output, shape index: {}]  }
   0x1   :  { %v23_v0 = vld [vmem:[%s745_s1] sm:$0xff]  ;;  %v24_v1 = vld [vmem:[%s745_s1 + $0x8] sm:$0xff]  ;;  %v25_v2 = vld [vmem:[%s745_s1 + $0x10] sm:$0xff]  ;;  %538 = vmatprep.subr.bf16.mxu0 %v588_v3  ;;  %525 = vmatprep.mubr.msk.f32.mxu0 %vm589_vm0, %v590_v6 }
   0x2   :  { %v539_v4 = vpack.c.bf16 %v24_v1, %v23_v0  ;;  %v26_v5 = vld [vmem:[%s745_s1 + $0x18] sm:$0xff]  ;;  %v12_v7 = vld [vmem:[%s744_s0] sm:$0xff]  ;;  %528 = vmatprep.subr.mxu1 %v590_v6  ;;  %530 = vmatprep.mubr.msk.f32.mxu1 %vm589_vm0, %v590_v6  ;;  %v471_v9 = vld [vmem:[%s744_s0 + $0x8] sm:$0xff] }
   0x3   :  { %v542_v8 = vpack.c.bf16 %v26_v5, %v25_v2  ;;  %v472_v10 = vld [vmem:[%s744_s0 + $0x10] sm:$0xff]  ;;  %v27_v11 = vld [vmem:[%s745_s1 + $0x20] sm:$0xff]  ;;  %v28_v12 = vld [vmem:[%s745_s1 + $0x28] sm:$0xff]  ;;  %v15_v13 = vadd.f32 %v471_v9, %v12_v7 }
   0x4   :  { %540 = vmatpush3.bf16.msra.mxu0 %v539_v4 }
   0x5   :  { %541 = vmatprep.subr.bf16.mxu0 %v588_v3 }
   0x6   :  { %7 = vsyncpa [#allocation3], 0  ;;  %v18_v14 = vadd.f32 %v472_v10, %v15_v13  ;;  %v545_v15 = vpack.c.bf16 %v28_v12, %v27_v11  ;;  %v473_v16 = vld [vmem:[%s744_s0 + $0x18] sm:$0xff]  ;;  %v29_v17 = vld [vmem:[%s745_s1 + $0x30] sm:$0xff]  ;;  %vm36_vm1 = vcmask 523264   ;;  %vm111_vm2 = vcmask 130048  }
   0x7   :  { %v30_v18 = vld [vmem:[%s745_s1 + $0x38] sm:$0xff]  ;;  %v474_v22 = vld [vmem:[%s745_s1 + $0x40] ss:$0 sm:$0xff]  ;;  %s591_s0 = smov 112   ;;  %v220_v49 = vlaneseq  ;;  %vm226_vm8 = vcmask 64512   ;;  %s592_s1 = smov 8  }
   0x8   :  { %543 = vmatpush3.bf16.msra.mxu0 %v542_v8  ;;  %v21_v19 = vadd.f32 %v473_v16, %v18_v14  ;;  %v548_v20 = vpack.c.bf16 %v30_v18, %v29_v17  ;;  %s593_s7 = smov [#allocation2]  }
   0x9   :  { %544 = vmatprep.subr.bf16.mxu0 %v588_v3  ;;  %v662_v50 = vshrl.u32 %v220_v49, 7  ;;  %v223_v51 = vand.u32 127, %v220_v49  ;;  %s463_s8 = sshll.u32 %s593_s7, 4  ;;  %s464_s8 = int_to_ptr.vmem [resolvable:$true] %s463_s8 }
   0xa   :  { %v22_v21 = vmul.f32 0.25, %v21_v19  ;;  %s564_s9 = scalar_lea.vmem %s464_s8, 16  ;;  %s568_s10 = scalar_lea.vmem %s464_s8, 32 }
   0xb   :  { %vm224_vm7 = vcmp.eq.s32.totalorder %v662_v50, %v223_v51  ;;  %v334_v12 = vsub.s32 0, %v662_v50  ;;  %vm340_vm11 = vcmp.gt.s32.totalorder %v662_v50, 0  ;;  %p565_p0 = scmp.ne.s32.totalorder %s464_s8, %s564_s9  ;;  %p569_p1 = scmp.lt.s32.totalorder %s464_s8, %s464_s8 }
   0xc   :  { %546 = vmatpush3.bf16.msra.mxu0 %v545_v15  ;;  %v348_v15 = vsub.s32 1, %v662_v50  ;;  %p570_p2 = scmp.lt.s32.totalorder %s568_s10, %s564_s9 }
   0xd   :  { %547 = vmatprep.subr.bf16.mxu0 %v588_v3 }
   0xe   :  { %p571_p3 = por %p570_p2, %p569_p1 }
  0x10   :  { %549 = vmatpush3.bf16.msra.mxu0 %v548_v20  ;;  %v362_v20 = vsub.s32 2, %v662_v50  ;;  %p572_p4 = pnand %p571_p3, %p565_p0 }
  0x13   :  { %526 = vmatmul.mubr.msk.f32.vlgmr.msra.gmra.mrb[0].mxu0 %vm36_vm1, %v22_v21 }
  0xe6   :  { %v106_v23 = vpop.f32.mrb[0].mxu0 }
  0xe7   :  { %v107_v24 = vadd.f32 %v474_v22, %v106_v23  ;;  %v527_v25 = vpop.f32.mrb[1].mxu0 }
  0xe9   :  { %v110_v26 = vmul.f32 %v107_v24, %v107_v24 }
  0xeb   :  { %123 = vrot.lane.b32.xlu0 %v110_v26, %s591_s0  ;;  %v112_v27 = vsel %vm111_vm2, %v110_v26, 0.0  ;;  %v376_v26 = vsub.s32 3, %v662_v50 }
  0xec   :  { %113 = vadd.xlane.f32.xlu1 %v112_v27 }
 0x15d   :  { %v124_v28 = vpop.permute.xlu0 %123 }
 0x15e   :  { %v126_v29 = vsel %vm111_vm2, %v124_v28, 0.0 }
 0x15f   :  { %127 = vadd.xlane.f32.xlu0 %v126_v29 }
 0x179   :  { %v114_v39 = vpop.xlane.xlu1 %113 }
 0x17a   :  { %vm117_vm5 = vcmp.eq.f32.partialorder %v114_v39, inf  ;;  %v120_v43 = vand.u32 2147483648, %v114_v39  ;;  %vm119_vm6 = vcmp.eq.f32.partialorder %v114_v39, 0.0 }
 0x1ec   :  { %v128_v30 = vpop.xlane.xlu0 %127 }
 0x1ed   :  { %556 = vrsqrt.f32 %v128_v30  ;;  %vm131_vm3 = vcmp.eq.f32.partialorder %v128_v30, inf  ;;  %v134_v33 = vand.u32 2147483648, %v128_v30  ;;  %vm133_vm4 = vcmp.eq.f32.partialorder %v128_v30, 0.0 }
 0x1f7   :  { %v557_v31 = vpop.eup %556 }
 0x1f8   :  { %v130_v32 = vmul.f32 %v557_v31, %v128_v30 }
 0x1fa   :  { %v132_v34 = vsel %vm131_vm3, %v128_v30, %v130_v32  ;;  %v390_v32 = vsub.s32 4, %v662_v50 }
 0x1fb   :  { %v135_v35 = vsel %vm133_vm4, %v134_v33, %v132_v34 }
 0x1fc   :  { %v139_v36 = vmax.f32 %v135_v35, 1e-08 }
 0x1fe   :  { %558 = vrcp.f32 %v139_v36 }
 0x1ff   :  { %560 = vrsqrt.f32 %v114_v39 }
 0x208   :  { %v559_v37 = vpop.eup %558 }
 0x209   :  { %v141_v38 = vmul.f32 %v559_v37, %v107_v24  ;;  %v561_v40 = vpop.eup %560 }
 0x20a   :  { %v116_v41 = vmul.f32 %v561_v40, %v114_v39 }
 0x20b   :  { %143 = vrot.lane.b32.xlu1 %v141_v38, %s591_s0  ;;  %v404_v38 = vsub.s32 5, %v662_v50 }
 0x20c   :  { %v118_v42 = vsel %vm117_vm5, %v114_v39, %v116_v41  ;;  %vm368_vm5 = vcmp.gt.s32.totalorder %v662_v50, 2 }
 0x20d   :  { %v121_v44 = vsel %vm119_vm6, %v120_v43, %v118_v42 }
 0x20e   :  { %v136_v45 = vmax.f32 %v121_v44, 1e-08  ;;  %v418_v44 = vsub.s32 6, %v662_v50 }
 0x210   :  { %562 = vrcp.f32 %v136_v45 }
 0x21a   :  { %v563_v46 = vpop.eup %562 }
 0x21b   :  { %v138_v48 = vmul.f32 %v563_v46, %v107_v24 }
 0x27d   :  { %v144_v47 = vpop.permute.xlu1 %143 }
 0x27e   :  { %529 = vmatpush3.xpose.msk.msra.mxu1 %vm111_vm2, %v144_v47 }
 0x27f   :  { %533 = vmatprep.subr.mxu1 %v590_v6 }
 0x281   :  { %531 = vmatmul.mubr.msk.f32.vlgmr.msra.gmra.mrb[0].mxu1 %vm111_vm2, %v138_v48 }
 0x282   :  { %534 = vmatpush3.xpose.msk.msra.mxu1 %vm111_vm2, %v138_v48  ;;  %535 = vmatprep.mubr.msk.f32.mxu1 %vm589_vm0, %v590_v6  ;;  %vm354_vm0 = vcmp.gt.s32.totalorder %v662_v50, 1 }
 0x285   :  { %536 = vmatmul.mubr.msk.f32.vlgmr.msra.gmra.mrb[2].mxu1 %vm111_vm2, %v144_v47 }
 0x354   :  { %v216_v52 = vpop.f32.mrb[0].mxu1 }
 0x355   :  { %v225_v53 = vsel %vm224_vm7, %v216_v52, 0.0  ;;  %v532_v54 = vpop.f32.mrb[1].mxu1  ;;  %v307_v0 = vadd.f32 0.2, %v216_v52 }
 0x356   :  { %v227_v55 = vsel %vm226_vm8, %v225_v53, 0.0 }
 0x357   :  { %v228_v56 = vrot.slane %v227_v55, 4 }
 0x358   :  { %v300_v57 = vpop.f32.mrb[2].mxu1 }
 0x359   :  { %v229_v58 = vadd.f32 %v228_v56, %v227_v55  ;;  %v537_v59 = vpop.f32.mrb[3].mxu1  ;;  %v301_v1 = vadd.f32 0.2, %v300_v57  ;;  %v432_v55 = vsub.s32 7, %v662_v50 }
 0x35b   :  { %v230_v60 = vrot.slane %v229_v58, 2 }
 0x35d   :  { %v231_v61 = vadd.f32 %v230_v60, %v229_v58 }
 0x35f   :  { %v232_v62 = vrot.slane %v231_v61, 1 }
 0x361   :  { %v233_v63 = vadd.f32 %v232_v62, %v231_v61 }
 0x363   :  { %v308_v2 = vsub.f32 %v307_v0, %v233_v63  ;;  %v304_v3 = vsub.f32 %v301_v1, %v233_v63 }
 0x365   :  { %v309_v4 = vmax.f32 %v308_v2, 0.0  ;;  %v305_v7 = vmax.f32 %v304_v3, 0.0 }
 0x367   :  { %v310_v5 = vsel %vm224_vm7, 0.0, %v309_v4  ;;  %v306_v8 = vsel %vm224_vm7, 0.0, %v305_v7 }
 0x368   :  { %328 = vrot.lane.b32.xlu1 %v310_v5, %s592_s1  ;;  %vm311_vm9 = vcmp.gt.f32.partialorder %v306_v8, 0.0 }
 0x369   :  { %v480_v9 = vsel %vm311_vm9, 1.0, %v590_v6  ;;  %vm382_vm9 = vcmp.gt.s32.totalorder %v662_v50, 3 }
 0x36a   :  { %v314_v10 = vsel %vm226_vm8, %v480_v9, 0.0 }
 0x38c   :  { %315 = vadd.xlane.f32.xlu1 %v314_v10 }
 0x3da   :  { %v329_v11 = vpop.permute.xlu1 %328 }
 0x3db   :  { %v676_v13 = vsel %vm226_vm8, %v306_v8, %v329_v11 }
 0x3dc   :  { %v335_v14 = vrot.slane %v676_v13, %v334_v12  ;;  %v349_v16 = vrot.slane %v676_v13, %v348_v15  ;;  %v363_v23 = vrot.slane %v676_v13, %v362_v20  ;;  %v377_v29 = vrot.slane %v676_v13, %v376_v26 }
 0x3dd   :  { %v391_v35 = vrot.slane %v676_v13, %v390_v32  ;;  %v405_v41 = vrot.slane %v676_v13, %v404_v38  ;;  %v419_v49 = vrot.slane %v676_v13, %v418_v44  ;;  %v433_v60 = vrot.slane %v676_v13, %v432_v55 }
 0x3de   :  { %vm339_vm10 = vcmp.eq.f32.partialorder %v335_v14, %v676_v13  ;;  %vm336_vm12 = vcmp.gt.f32.partialorder %v335_v14, %v676_v13  ;;  %vm350_vm14 = vcmp.gt.f32.partialorder %v349_v16, %v676_v13  ;;  %vm353_vm15 = vcmp.eq.f32.partialorder %v349_v16, %v676_v13 }
 0x3df   :  { %vm341_vm13 = vmand %vm339_vm10, %vm340_vm11  ;;  %v481_v17 = vsel %vm336_vm12, 1.0, %v590_v6  ;;  %v483_v21 = vsel %vm350_vm14, 1.0, %v590_v6  ;;  %vm364_vm3 = vcmp.gt.f32.partialorder %v363_v23, %v676_v13  ;;  %vm367_vm4 = vcmp.eq.f32.partialorder %v363_v23, %v676_v13 }
 0x3e0   :  { %v482_v18 = vsel %vm341_vm13, 1.0, %v590_v6  ;;  %vm355_vm1 = vmand %vm353_vm15, %vm354_vm0  ;;  %v485_v27 = vsel %vm364_vm3, 1.0, %v590_v6  ;;  %vm378_vm7 = vcmp.gt.f32.partialorder %v377_v29, %v676_v13  ;;  %vm381_vm8 = vcmp.eq.f32.partialorder %v377_v29, %v676_v13 }
 0x3e1   :  { %v345_v19 = vadd.f32 %v482_v18, %v481_v17  ;;  %v484_v24 = vsel %vm355_vm1, 1.0, %v590_v6  ;;  %vm369_vm6 = vmand %vm367_vm4, %vm368_vm5  ;;  %v487_v33 = vsel %vm378_vm7, 1.0, %v590_v6  ;;  %vm392_vm11 = vcmp.gt.f32.partialorder %v391_v35, %v676_v13 }
 0x3e2   :  { %v486_v30 = vsel %vm369_vm6, 1.0, %v590_v6  ;;  %vm383_vm10 = vmand %vm381_vm8, %vm382_vm9  ;;  %vm395_vm12 = vcmp.eq.f32.partialorder %v391_v35, %v676_v13  ;;  %vm396_vm13 = vcmp.gt.s32.totalorder %v662_v50, 4  ;;  %v489_v39 = vsel %vm392_vm11, 1.0, %v590_v6 }
 0x3e3   :  { %v358_v22 = vadd.f32 %v483_v21, %v345_v19  ;;  %v488_v36 = vsel %vm383_vm10, 1.0, %v590_v6  ;;  %vm397_vm14 = vmand %vm395_vm12, %vm396_vm13  ;;  %vm406_vm15 = vcmp.gt.f32.partialorder %v405_v41, %v676_v13  ;;  %vm409_vm0 = vcmp.eq.f32.partialorder %v405_v41, %v676_v13 }
 0x3e4   :  { %v490_v42 = vsel %vm397_vm14, 1.0, %v590_v6  ;;  %vm410_vm1 = vcmp.gt.s32.totalorder %v662_v50, 5  ;;  %v491_v46 = vsel %vm406_vm15, 1.0, %v590_v6  ;;  %vm420_vm4 = vcmp.gt.f32.partialorder %v419_v49, %v676_v13 }
 0x3e5   :  { %v359_v25 = vadd.f32 %v484_v24, %v358_v22  ;;  %vm411_vm3 = vmand %vm409_vm0, %vm410_vm1  ;;  %vm423_vm5 = vcmp.eq.f32.partialorder %v419_v49, %v676_v13  ;;  %vm424_vm6 = vcmp.gt.s32.totalorder %v662_v50, 6  ;;  %v493_v57 = vsel %vm420_vm4, 1.0, %v590_v6 }
 0x3e6   :  { %v492_v52 = vsel %vm411_vm3, 1.0, %v590_v6  ;;  %vm425_vm7 = vmand %vm423_vm5, %vm424_vm6  ;;  %vm434_vm8 = vcmp.gt.f32.partialorder %v433_v60, %v676_v13  ;;  %vm455_vm10 = vcmask 0  }
 0x3e7   :  { %v372_v28 = vadd.f32 %v485_v27, %v359_v25  ;;  %v494_v62 = vsel %vm425_vm7, 1.0, %v590_v6  ;;  %v495_v2 = vsel %vm434_vm8, 1.0, %v590_v6 }
 0x3e9   :  { %v373_v31 = vadd.f32 %v486_v30, %v372_v28 }
 0x3eb   :  { %v386_v34 = vadd.f32 %v487_v33, %v373_v31 }
 0x3ed   :  { %v387_v37 = vadd.f32 %v488_v36, %v386_v34 }
 0x3ef   :  { %v400_v40 = vadd.f32 %v489_v39, %v387_v37 }
 0x3f1   :  { %v401_v43 = vadd.f32 %v490_v42, %v400_v40 }
 0x3f3   :  { %v414_v48 = vadd.f32 %v491_v46, %v401_v43 }
 0x3f5   :  { %v415_v54 = vadd.f32 %v492_v52, %v414_v48 }
 0x3f7   :  { %v428_v59 = vadd.f32 %v493_v57, %v415_v54 }
 0x3f9   :  { %v429_v0 = vadd.f32 %v494_v62, %v428_v59 }
 0x3fb   :  { %v442_v50 = vadd.f32 %v495_v2, %v429_v0 }
 0x419   :  { %v316_v45 = vpop.xlane.xlu1 %315 }
 0x41a   :  { %v317_v47 = vrot.slane %v316_v45, 4 }
 0x41c   :  { %v318_v51 = vadd.f32 %v317_v47, %v316_v45 }
 0x41e   :  { %v319_v53 = vrot.slane %v318_v51, 2 }
 0x420   :  { %v320_v56 = vadd.f32 %v319_v53, %v318_v51 }
 0x422   :  { %v321_v58 = vrot.slane %v320_v56, 1 }
 0x424   :  { %v322_v61 = vadd.f32 %v321_v58, %v320_v56 }
 0x426   :  { %v324_v63 = vmul.f32 0.12499985, %v322_v61 }
 0x428   :  { %v325_v1 = vadd.f32 1.0, %v324_v63 }
 0x42a   :  { %v326_v3 = vfloor.f32 %v325_v1 }
 0x42c   :  { %vm444_vm9 = vcmp.lt.f32.partialorder %v442_v50, %v326_v3 }
 0x42d   :  { %v445_v4 = vsel %vm444_vm9, %v676_v13, 0.0 }
 0x42e   :  { %v446_v5 = vsel %vm111_vm2, %v445_v4, 0.0 }
 0x42f   :  { %447 = vadd.xlane.f32.xlu0 %v446_v5 }
 0x4bc   :  { %v448_v7 = vpop.xlane.xlu0 %447 }
 0x4bd   :  { %v449_v8 = vrot.slane %v448_v7, 4 }
 0x4bf   :  { %v450_v9 = vadd.f32 %v449_v8, %v448_v7 }
 0x4c1   :  { %v451_v10 = vrot.slane %v450_v9, 2 }
 0x4c3   :  { %v452_v11 = vadd.f32 %v451_v10, %v450_v9 }
 0x4c5   :  { %v453_v12 = vrot.slane %v452_v11, 1 }
 0x4c7   :  { %v454_v14 = vadd.f32 %v453_v12, %v452_v11 }
 0x4c9   :  { %456 = vst.msk [vmem:[#allocation2] sm:$0x1] %vm455_vm10, %v454_v14 }
 0x4ca   :  { %575 = shalt.err (!%p572_p4)
}
 0x4cb   :  { %s576_s13 = scalar_lea.hbm %s746_s2, 16 }
 0x4cc   :  { %p577_p5 = scmp.ne.s32.totalorder %s746_s2, %s576_s13  ;;  %p580_p6 = scmp.lt.u32.totalorder %s576_s13, %s746_s2 }
 0x4ce   :  { %p582_p7 = pnand %p580_p6, %p577_p5 }
 0x4d0   :  { %585 = shalt.err (!%p582_p7)
}
 0x4d1   :  { %466 = dma.vmem_to_hbm [thread:$0]  %s464_s8, 16, %s746_s2, [#allocation3]  }
 0x4d2   :  { %586 = dma.done.wait [#allocation3], 16  }
 0x4d3   :  { %587 = vsyncadd [#allocation3], 4294967280 }
 0x4d4   :  { %470 = vsyncpa [#allocation3], 1 }

</bundles_post_ra>
